<compile_context>
chip_gen: v7x
topology: tpu7x:2x2x1
jax: 0.10.0
libtpu: 0.0.40
codegen_flags: <defaults>
</compile_context>

<pallas_src>
import functools
import math

import jax
import jax.numpy as jnp
from jax.experimental import pallas as pl
from jax.experimental.pallas import tpu as pltpu


_LANES = 512            # lane-dense last dim (multiple of 128)
_MAX_TILE_ROWS = 1024   # 1024 x 512 x f32 = 2 MiB per block


def _round_up(a, b):
    return ((a + b - 1) // b) * b


def _mix32(x):
    """lowbias32-style bijective 32-bit integer mixer (uint32 in/out)."""
    x = x ^ (x >> jnp.uint32(16))
    x = x * jnp.uint32(0x7FEB352D)
    x = x ^ (x >> jnp.uint32(15))
    x = x * jnp.uint32(0x846CA68B)
    x = x ^ (x >> jnp.uint32(16))
    return x


def _bits_to_uniform(bits):
    """uint32 bits -> float32 uniform strictly inside (0, 1)."""
    hi = (bits >> jnp.uint32(8)).astype(jnp.int32).astype(jnp.float32)  # top 24 bits
    return (hi + jnp.float32(0.5)) * jnp.float32(1.0 / (1 << 24))


def _gaussian_noise_kernel(seed_ref, x_ref, o_ref, *, sigma, tile_rows, lanes):
    half = lanes // 2  # 256: lane-aligned split point (multiple of 128)

    # Unique per-(u1,u2)-pair counter across the whole (padded) tensor.
    row = jax.lax.broadcasted_iota(jnp.int32, (tile_rows, half), 0)
    col = jax.lax.broadcasted_iota(jnp.int32, (tile_rows, half), 1)
    pair = (pl.program_id(0) * (tile_rows * half) + row * half + col).astype(jnp.uint32)

    # Seed-derived key; hashing decorrelates sequential seeds / tiles.
    key = _mix32(seed_ref[0].astype(jnp.uint32) ^ jnp.uint32(0x9E3779B9))

    c = pair * jnp.uint32(2)
    u1 = _bits_to_uniform(_mix32(c ^ key))
    u2 = _bits_to_uniform(_mix32((c + jnp.uint32(1)) ^ key))

    # Box-Muller; sigma folded into the radius so the scale is applied on the
    # half-width tile instead of the full tile.
    r = jnp.sqrt(jnp.float32(-2.0) * jnp.log(u1)) * jnp.float32(sigma)
    theta = jnp.float32(2.0 * math.pi) * u2
    z_lo = r * jnp.cos(theta)
    z_hi = r * jnp.sin(theta)

    x_lo = x_ref[:, :half].astype(jnp.float32)
    x_hi = x_ref[:, half:].astype(jnp.float32)
    o_ref[:, :half] = (x_lo + z_lo).astype(o_ref.dtype)
    o_ref[:, half:] = (x_hi + z_hi).astype(o_ref.dtype)


def gaussian_noise(x, sigma, seed=0):
    """Return x + N(0, sigma^2) noise, same shape/dtype as x (any shape)."""
    orig_shape = x.shape
    total = x.size

    lanes = _LANES
    rows_needed = max(1, -(-total // lanes))          # cdiv
    rows8 = _round_up(rows_needed, 8)
    if rows8 <= _MAX_TILE_ROWS:
        tile_rows = rows8
    else:
        n_tiles = -(-rows8 // _MAX_TILE_ROWS)
        tile_rows = _round_up(-(-rows8 // n_tiles), 8)
    rows = _round_up(rows8, tile_rows)
    padded_total = rows * lanes

    flat = x.reshape(-1)
    if padded_total != total:
        flat = jnp.pad(flat, (0, padded_total - total))
    x2 = flat.reshape(rows, lanes)

    seed_arr = jnp.asarray([seed], dtype=jnp.int32)

    out2 = pl.pallas_call(
        functools.partial(
            _gaussian_noise_kernel,
            sigma=float(sigma),
            tile_rows=tile_rows,
            lanes=lanes,
        ),
        out_shape=jax.ShapeDtypeStruct((rows, lanes), x.dtype),
        grid_spec=pltpu.PrefetchScalarGridSpec(
            num_scalar_prefetch=1,
            grid=(rows // tile_rows,),
            in_specs=[pl.BlockSpec((tile_rows, lanes), lambda i, seed: (i, 0))],
            out_specs=pl.BlockSpec((tile_rows, lanes), lambda i, seed: (i, 0)),
        ),
        compiler_params=pltpu.CompilerParams(
            dimension_semantics=("parallel",),
            vmem_limit_bytes=32 * 1024 * 1024,
        ),
    )(seed_arr, x2)

    out = out2.reshape(-1)
    if padded_total != total:
        out = out[:total]
    return out.reshape(orig_shape)


if __name__ == "__main__":
    sigma = 0.1

    key = jax.random.PRNGKey(0)
    x = jax.random.normal(key, (2, 4, 16, 16), dtype=jnp.float32)  # NCHW

    y = gaussian_noise(x, sigma, seed=0)
    y = jax.block_until_ready(y)

    # Sanity checks: shape/dtype preserved, noise magnitude ~ sigma.
    assert y.shape == x.shape and y.dtype == x.dtype
    noise = y - x
    noise_std = float(jnp.std(noise))
    noise_mean = float(jnp.mean(noise))
    assert abs(noise_mean) < 5 * sigma / (x.size ** 0.5) + 0.02, noise_mean
    assert 0.5 * sigma < noise_std < 1.5 * sigma, noise_std

    print("KERNEL_OK")
</pallas_src>

<mosaic_0001>
module attributes {stable_mosaic.version = 11 : i64} {
  func.func @_gaussian_noise_kernel(%arg0: i32, %arg1: memref<1xi32, #tpu.memory_space<smem>>, %arg2: memref<8x512xf32, #tpu.memory_space<vmem>>, %arg3: memref<8x512xf32, #tpu.memory_space<vmem>>) attributes {dimension_semantics = [#tpu.dimension_semantics<parallel>], iteration_bounds = array<i64: 1>, scalar_prefetch = 1 : i64, scratch_operands = 0 : i64, tpu.core_type = #tpu.core_type<tc>, window_params = [{transform_indices = @transform_0, window_bounds = array<i64: 8, 512>}, {transform_indices = @transform_1, window_bounds = array<i64: 8, 512>}]} {
    %0 = tpu.iota {dimensions = array<i32: 0>} : vector<8x256xi32>
    %1 = tpu.iota {dimensions = array<i32: 1>} : vector<8x256xi32>
    %c2048_i32 = arith.constant 2048 : i32
    %2 = arith.muli %arg0, %c2048_i32 : i32
    %c256_i32 = arith.constant 256 : i32
    %3 = vector.broadcast %c256_i32 : i32 to vector<8x256xi32>
    %4 = arith.muli %0, %3 : vector<8x256xi32>
    %5 = vector.broadcast %2 : i32 to vector<8x256xi32>
    %6 = arith.addi %5, %4 : vector<8x256xi32>
    %7 = arith.addi %6, %1 : vector<8x256xi32>
    %c0 = arith.constant 0 : index
    %8 = memref.load %arg1[%c0] : memref<1xi32, #tpu.memory_space<smem>>
    %c-1640531527_i32 = arith.constant -1640531527 : i32
    %9 = arith.xori %8, %c-1640531527_i32 : i32
    %c16_i32 = arith.constant 16 : i32
    %10 = arith.shrui %9, %c16_i32 : i32
    %11 = arith.xori %9, %10 : i32
    %c2146121005_i32 = arith.constant 2146121005 : i32
    %12 = arith.muli %11, %c2146121005_i32 : i32
    %c15_i32 = arith.constant 15 : i32
    %13 = arith.shrui %12, %c15_i32 : i32
    %14 = arith.xori %12, %13 : i32
    %c-2073254261_i32 = arith.constant -2073254261 : i32
    %15 = arith.muli %14, %c-2073254261_i32 : i32
    %c16_i32_0 = arith.constant 16 : i32
    %16 = arith.shrui %15, %c16_i32_0 : i32
    %17 = arith.xori %15, %16 : i32
    %c2_i32 = arith.constant 2 : i32
    %18 = vector.broadcast %c2_i32 : i32 to vector<8x256xi32>
    %19 = arith.muli %7, %18 : vector<8x256xi32>
    %20 = vector.broadcast %17 : i32 to vector<8x256xi32>
    %21 = arith.xori %19, %20 : vector<8x256xi32>
    %c16_i32_1 = arith.constant 16 : i32
    %22 = vector.broadcast %c16_i32_1 : i32 to vector<8x256xi32>
    %23 = arith.shrui %21, %22 : vector<8x256xi32>
    %24 = arith.xori %21, %23 : vector<8x256xi32>
    %c2146121005_i32_2 = arith.constant 2146121005 : i32
    %25 = vector.broadcast %c2146121005_i32_2 : i32 to vector<8x256xi32>
    %26 = arith.muli %24, %25 : vector<8x256xi32>
    %c15_i32_3 = arith.constant 15 : i32
    %27 = vector.broadcast %c15_i32_3 : i32 to vector<8x256xi32>
    %28 = arith.shrui %26, %27 : vector<8x256xi32>
    %29 = arith.xori %26, %28 : vector<8x256xi32>
    %c-2073254261_i32_4 = arith.constant -2073254261 : i32
    %30 = vector.broadcast %c-2073254261_i32_4 : i32 to vector<8x256xi32>
    %31 = arith.muli %29, %30 : vector<8x256xi32>
    %c16_i32_5 = arith.constant 16 : i32
    %32 = vector.broadcast %c16_i32_5 : i32 to vector<8x256xi32>
    %33 = arith.shrui %31, %32 : vector<8x256xi32>
    %34 = arith.xori %31, %33 : vector<8x256xi32>
    %c8_i32 = arith.constant 8 : i32
    %35 = vector.broadcast %c8_i32 : i32 to vector<8x256xi32>
    %36 = arith.shrui %34, %35 : vector<8x256xi32>
    %37 = arith.sitofp %36 : vector<8x256xi32> to vector<8x256xf32>
    %cst = arith.constant 5.000000e-01 : f32
    %38 = vector.broadcast %cst : f32 to vector<8x256xf32>
    %39 = arith.addf %37, %38 : vector<8x256xf32>
    %cst_6 = arith.constant 5.96046448E-8 : f32
    %40 = vector.broadcast %cst_6 : f32 to vector<8x256xf32>
    %41 = arith.mulf %39, %40 : vector<8x256xf32>
    %c1_i32 = arith.constant 1 : i32
    %42 = vector.broadcast %c1_i32 : i32 to vector<8x256xi32>
    %43 = arith.addi %19, %42 : vector<8x256xi32>
    %44 = vector.broadcast %17 : i32 to vector<8x256xi32>
    %45 = arith.xori %43, %44 : vector<8x256xi32>
    %c16_i32_7 = arith.constant 16 : i32
    %46 = vector.broadcast %c16_i32_7 : i32 to vector<8x256xi32>
    %47 = arith.shrui %45, %46 : vector<8x256xi32>
    %48 = arith.xori %45, %47 : vector<8x256xi32>
    %c2146121005_i32_8 = arith.constant 2146121005 : i32
    %49 = vector.broadcast %c2146121005_i32_8 : i32 to vector<8x256xi32>
    %50 = arith.muli %48, %49 : vector<8x256xi32>
    %c15_i32_9 = arith.constant 15 : i32
    %51 = vector.broadcast %c15_i32_9 : i32 to vector<8x256xi32>
    %52 = arith.shrui %50, %51 : vector<8x256xi32>
    %53 = arith.xori %50, %52 : vector<8x256xi32>
    %c-2073254261_i32_10 = arith.constant -2073254261 : i32
    %54 = vector.broadcast %c-2073254261_i32_10 : i32 to vector<8x256xi32>
    %55 = arith.muli %53, %54 : vector<8x256xi32>
    %c16_i32_11 = arith.constant 16 : i32
    %56 = vector.broadcast %c16_i32_11 : i32 to vector<8x256xi32>
    %57 = arith.shrui %55, %56 : vector<8x256xi32>
    %58 = arith.xori %55, %57 : vector<8x256xi32>
    %c8_i32_12 = arith.constant 8 : i32
    %59 = vector.broadcast %c8_i32_12 : i32 to vector<8x256xi32>
    %60 = arith.shrui %58, %59 : vector<8x256xi32>
    %61 = arith.sitofp %60 : vector<8x256xi32> to vector<8x256xf32>
    %cst_13 = arith.constant 5.000000e-01 : f32
    %62 = vector.broadcast %cst_13 : f32 to vector<8x256xf32>
    %63 = arith.addf %61, %62 : vector<8x256xf32>
    %cst_14 = arith.constant 5.96046448E-8 : f32
    %64 = vector.broadcast %cst_14 : f32 to vector<8x256xf32>
    %65 = arith.mulf %63, %64 : vector<8x256xf32>
    %66 = math.log %41 : vector<8x256xf32>
    %cst_15 = arith.constant -2.000000e+00 : f32
    %67 = vector.broadcast %cst_15 : f32 to vector<8x256xf32>
    %68 = arith.mulf %67, %66 : vector<8x256xf32>
    %69 = math.sqrt %68 : vector<8x256xf32>
    %cst_16 = arith.constant 1.000000e-01 : f32
    %70 = vector.broadcast %cst_16 : f32 to vector<8x256xf32>
    %71 = arith.mulf %69, %70 : vector<8x256xf32>
    %cst_17 = arith.constant 6.28318548 : f32
    %72 = vector.broadcast %cst_17 : f32 to vector<8x256xf32>
    %73 = arith.mulf %72, %65 : vector<8x256xf32>
    %74 = math.cos %73 : vector<8x256xf32>
    %75 = arith.mulf %71, %74 : vector<8x256xf32>
    %76 = math.sin %73 : vector<8x256xf32>
    %77 = arith.mulf %71, %76 : vector<8x256xf32>
    %c0_18 = arith.constant 0 : index
    %c0_19 = arith.constant 0 : index
    %78 = vector.load %arg2[%c0_18, %c0_19] : memref<8x512xf32, #tpu.memory_space<vmem>>, vector<8x256xf32>
    %c0_20 = arith.constant 0 : index
    %c256 = arith.constant 256 : index
    %79 = vector.load %arg2[%c0_20, %c256] : memref<8x512xf32, #tpu.memory_space<vmem>>, vector<8x256xf32>
    %80 = arith.addf %78, %75 : vector<8x256xf32>
    %c0_21 = arith.constant 0 : index
    %c0_22 = arith.constant 0 : index
    %81 = vector.load %arg3[%c0_21, %c0_22] : memref<8x512xf32, #tpu.memory_space<vmem>>, vector<8x256xf32>
    tpu.vector_store %arg3[%c0_21, %c0_22], %80 {strides = array<i32>} : memref<8x512xf32, #tpu.memory_space<vmem>>, vector<8x256xf32>,
    %82 = arith.addf %79, %77 : vector<8x256xf32>
    %c0_23 = arith.constant 0 : index
    %c256_24 = arith.constant 256 : index
    %83 = vector.load %arg3[%c0_23, %c256_24] : memref<8x512xf32, #tpu.memory_space<vmem>>, vector<8x256xf32>
    tpu.vector_store %arg3[%c0_23, %c256_24], %82 {strides = array<i32>} : memref<8x512xf32, #tpu.memory_space<vmem>>, vector<8x256xf32>,
    return
  }
  func.func @transform_0(%arg0: i32, %arg1: memref<1xi32, #tpu.memory_space<smem>>) -> (i32, i32) {
    %c0_i32 = arith.constant 0 : i32
    %c0_i32_0 = arith.constant 0 : i32
    return %arg0, %c0_i32 : i32, i32
  }
  func.func @transform_1(%arg0: i32, %arg1: memref<1xi32, #tpu.memory_space<smem>>) -> (i32, i32) {
    %c0_i32 = arith.constant 0 : i32
    %c0_i32_0 = arith.constant 0 : i32
    return %arg0, %c0_i32 : i32, i32
  }
}

</mosaic_0001>

<bundles_post_ra>
// kernel: tpu_custom_call.1
= control target key start
LH: loop header
LB: loop body
LE: loop exit
PB: predicated region body
PF: predicated region fallthrough
CT: control target
= control target key end

     0   :  { %8 = vsyncpa [#allocation5], 0  ;;  %s808_s0 = inlined_call_operand.<no memory space> [shape: s32[1], index: 0, kind: input, shape index: {}]   ;;  %s809_s1 = inlined_call_operand.hbm [shape: f32[8,512], index: 1, kind: input, shape index: {}]   ;;  %s810_s2 = inlined_call_operand.hbm [shape: f32[8,512], index: 2, kind: output, shape index: {}]  }
   0x1   :  { %9 = vsyncpa [#allocation6], 0  ;;  %s666_s9 = smov [#allocation4]   ;;  %s618_s13 = scalar_lea.hbm %s809_s1, 512 }
   0x2   :  { %s16_s10 = sshll.u32 %s666_s9, 4  ;;  %p619_p0 = scmp.ne.s32.totalorder %s809_s1, %s618_s13  ;;  %s17_s10 = int_to_ptr.vmem [resolvable:$true] %s16_s10 }
   0x3   :  { %p622_p1 = scmp.lt.u32.totalorder %s618_s13, %s809_s1 }
   0x5   :  { %p624_p2 = pnand %p622_p1, %p619_p0 }
   0x7   :  { %627 = shalt.err (!%p624_p2)
}
   0x8   :  { %s628_s18 = scalar_lea.vmem %s17_s10, 512  ;;  %p633_p4 = scmp.lt.s32.totalorder %s17_s10, %s17_s10 }
   0x9   :  { %p629_p3 = scmp.ne.s32.totalorder %s17_s10, %s628_s18  ;;  %p634_p5 = scmp.lt.s32.totalorder %s628_s18, %s628_s18 }
   0xb   :  { %p635_p6 = por %p634_p5, %p633_p4 }
   0xd   :  { %p636_p7 = pnand %p635_p6, %p629_p3 }
   0xf   :  { %639 = shalt.err (!%p636_p7)
}
  0x10   :  { %19 = dma.hbm_to_vmem [thread:$0]  %s809_s1, 512, %s17_s10, [#allocation5]  }
  0x11   :  { %662 = dma.done.wait [#allocation5], 512  }
  0x12   :  { %663 = vsyncadd [#allocation5], 4294966784  ;;  %v23_v0 = vlaneseq  ;;  %s35_s23 = sxor.u32 2654435769, %s808_s0  ;;  %s673_s0 = smov [#allocation7]  }
  0x13   :  { %s36_s24 = sshrl.u32 %s35_s23, 16  ;;  %s561_s3 = sshll.u32 %s673_s0, 4  ;;  %s562_s3 = int_to_ptr.vmem [resolvable:$true] %s561_s3 }
  0x14   :  { %v24_v1 = vshrl.u32 %v23_v0, 7  ;;  %v26_v2 = vand.u32 127, %v23_v0  ;;  %s37_s25 = sxor.u32 %s36_s24, %s35_s23  ;;  %s640_s4 = scalar_lea.vmem %s562_s3, 512 }
  0x15   :  { %s38_s26 = smul.u32 2146121005, %s37_s25  ;;  %p641_p8 = scmp.ne.s32.totalorder %s562_s3, %s640_s4 }
  0x16   :  { %v29_v3 = vmul.u32 256, %v24_v1  ;;  %v27_v4 = vadd.s32 128, %v26_v2  ;;  %p645_p9 = scmp.lt.s32.totalorder %s562_s3, %s562_s3  ;;  %p646_p10 = scmp.lt.s32.totalorder %s640_s4, %s640_s4 }
  0x17   :  { %s39_s27 = sshrl.u32 %s38_s26, 15 }
  0x18   :  { %v32_v5 = vadd.s32 %v29_v3, %v26_v2  ;;  %s40_s28 = sxor.u32 %s39_s27, %s38_s26  ;;  %v33_v6 = vadd.s32 %v29_v3, %v27_v4  ;;  %p647_p11 = por %p646_p10, %p645_p9 }
  0x19   :  { %s41_s29 = smul.u32 2221713035, %s40_s28 }
  0x1a   :  { %v44_v7 = vmul.u32 2, %v32_v5  ;;  %v45_v8 = vmul.u32 2, %v33_v6  ;;  %p648_p12 = pnand %p647_p11, %p641_p8 }
  0x1b   :  { %s42_s1 = sshrl.u32 %s41_s29, 16 }
  0x1c   :  { %s43_s30 = sxor.u32 %s42_s1, %s41_s29  ;;  %v73_v9 = vadd.s32 1, %v44_v7  ;;  %v74_v10 = vadd.s32 1, %v45_v8 }
  0x1d   :  { %v46_v11 = vstv %s43_s30 }
  0x1e   :  { %v75_v12 = vxor.u32 %v73_v9, %v46_v11  ;;  %v76_v13 = vxor.u32 %v74_v10, %v46_v11  ;;  %v47_v18 = vxor.u32 %v46_v11, %v44_v7  ;;  %v48_v25 = vxor.u32 %v46_v11, %v45_v8 }
  0x1f   :  { %v667_v9 = vmov 683565275   ;;  %v668_v11 = vmov 2475754826  }
  0x20   :  { %v77_v14 = vshrl.u32 %v75_v12, 16  ;;  %v78_v15 = vshrl.u32 %v76_v13, 16  ;;  %v49_v22 = vshrl.u32 %v47_v18, 16  ;;  %v50_v31 = vshrl.u32 %v48_v25, 16 }
  0x22   :  { %v79_v16 = vxor.u32 %v77_v14, %v75_v12  ;;  %v80_v17 = vxor.u32 %v78_v15, %v76_v13  ;;  %v51_v28 = vxor.u32 %v49_v22, %v47_v18  ;;  %v52_v37 = vxor.u32 %v50_v31, %v48_v25 }
  0x23   :  { %v669_v13 = vmov 2131351028   ;;  %v670_v22 = vmov 2102212464   ;;  %v671_v25 = vmov 920167782  }
  0x24   :  { %v81_v19 = vmul.u32 2146121005, %v79_v16  ;;  %v82_v20 = vmul.u32 2146121005, %v80_v17 }
  0x25   :  { %v53_v34 = vmul.u32 2146121005, %v51_v28  ;;  %v54_v43 = vmul.u32 2146121005, %v52_v37  ;;  %v672_v28 = vmov 1326507024  }
  0x26   :  { %v83_v21 = vshrl.u32 %v81_v19, 15  ;;  %v84_v23 = vshrl.u32 %v82_v20, 15 }
  0x27   :  { %v55_v40 = vshrl.u32 %v53_v34, 15  ;;  %v56_v49 = vshrl.u32 %v54_v43, 15 }
  0x28   :  { %v85_v24 = vxor.u32 %v83_v21, %v81_v19  ;;  %v86_v26 = vxor.u32 %v84_v23, %v82_v20 }
  0x29   :  { %v57_v46 = vxor.u32 %v55_v40, %v53_v34  ;;  %v58_v56 = vxor.u32 %v56_v49, %v54_v43 }
  0x2a   :  { %v87_v27 = vmul.u32 2221713035, %v85_v24  ;;  %v88_v29 = vmul.u32 2221713035, %v86_v26 }
  0x2b   :  { %v59_v52 = vmul.u32 2221713035, %v57_v46  ;;  %v60_v63 = vmul.u32 2221713035, %v58_v56 }
  0x2c   :  { %v89_v30 = vshrl.u32 %v87_v27, 16  ;;  %v90_v32 = vshrl.u32 %v88_v29, 16 }
  0x2d   :  { %v61_v59 = vshrl.u32 %v59_v52, 16  ;;  %v62_v7 = vshrl.u32 %v60_v63, 16 }
  0x2e   :  { %v91_v33 = vxor.u32 %v89_v30, %v87_v27  ;;  %v92_v35 = vxor.u32 %v90_v32, %v88_v29 }
  0x2f   :  { %v63_v1 = vxor.u32 %v61_v59, %v59_v52 }
  0x30   :  { %v93_v36 = vshrl.u32 %v91_v33, 8  ;;  %v94_v38 = vshrl.u32 %v92_v35, 8 }
  0x31   :  { %v65_v15 = vshrl.u32 %v63_v1, 8 }
  0x32   :  { %v95_v39 = vcvt.s32.f32 %v93_v36  ;;  %v96_v41 = vcvt.s32.f32 %v94_v38 }
  0x33   :  { %v67_v38 = vcvt.s32.f32 %v65_v15 }
  0x34   :  { %v97_v42 = vadd.f32 0.5, %v95_v39  ;;  %v98_v44 = vadd.f32 0.5, %v96_v41 }
  0x36   :  { %v99_v45 = vmul.f32 5.9604645e-08, %v97_v42  ;;  %v100_v47 = vmul.f32 5.9604645e-08, %v98_v44 }
  0x38   :  { %v704_v48 = vmul.f32 6.2831855, %v99_v45  ;;  %v706_v50 = vmul.f32 6.2831855, %v100_v47  ;;  %v64_v45 = vxor.u32 %v62_v7, %v60_v63 }
  0x3a   :  { %v128_v51 = vand.u32 2139095040, %v704_v48  ;;  %v125_v53 = vand.u32 2147483647, %v704_v48  ;;  %v231_v54 = vand.u32 2139095040, %v706_v50  ;;  %v228_v17 = vand.u32 2147483647, %v706_v50 }
  0x3b   :  { %vm127_vm13 = vcmp.lt.s32.totalorder %v704_v48, 0 }
  0x3c   :  { %v129_v55 = vshrl.u32 %v128_v51, 23  ;;  %v232_v57 = vshrl.u32 %v231_v54, 23  ;;  %v132_v60 = vand.u32 8388607, %v125_v53  ;;  %vm126_vm14 = vcmp.le.f32.partialorder %v125_v53, 0.7853982 }
  0x3e   :  { %v570_v58 = vadd.s32 4294967169, %v129_v55  ;;  %v574_v61 = vadd.s32 4294967169, %v232_v57  ;;  %v133_v2 = vor.u32 8388608, %v132_v60  ;;  %v69_v57 = vadd.f32 0.5, %v67_v38 }
  0x40   :  { %v135_v62 = vadd.s32 1, %v570_v58  ;;  %v238_v0 = vadd.s32 1, %v574_v61  ;;  %v714_v16 = vshll.u32 %v133_v2, 8  ;;  %v235_v58 = vand.u32 8388607, %v228_v17 }
  0x42   :  { %vm136_vm0 = vcmp.gt.s32.totalorder %v135_v62, 0  ;;  %vm239_vm1 = vcmp.gt.s32.totalorder %v238_v0, 0  ;;  %v236_v7 = vor.u32 8388608, %v235_v58 }
  0x43   :  { %v137_v3 = vsel %vm136_vm0, %v135_v62, 0  ;;  %v240_v5 = vsel %vm239_vm1, %v238_v0, 0 }
  0x44   :  { %v139_v4 = vand.u32 31, %v137_v3  ;;  %v138_v6 = vshrl.u32 %v137_v3, 5  ;;  %v242_v18 = vand.u32 31, %v240_v5  ;;  %v241_v61 = vshrl.u32 %v240_v5, 5 }
  0x46   :  { %v140_v8 = vsub.s32 32, %v139_v4  ;;  %v142_v10 = vshll.u32 %v667_v9, %v139_v4  ;;  %v145_v12 = vshll.u32 %v668_v11, %v139_v4  ;;  %v148_v14 = vshll.u32 %v669_v13, %v139_v4 }
  0x47   :  { %v151_v24 = vshll.u32 %v670_v22, %v139_v4  ;;  %v154_v27 = vshll.u32 %v671_v25, %v139_v4  ;;  %vm157_vm2 = vcmp.lt.s32.totalorder %v138_v6, 1  ;;  %vm158_vm3 = vcmp.lt.s32.totalorder %v138_v6, 2 }
  0x48   :  { %v141_v19 = vshrl.u32 %v667_v9, %v140_v8  ;;  %v143_v20 = vshrl.u32 %v668_v11, %v140_v8  ;;  %v146_v21 = vshrl.u32 %v669_v13, %v140_v8  ;;  %v149_v23 = vshrl.u32 %v670_v22, %v140_v8 }
  0x49   :  { %v152_v26 = vshrl.u32 %v671_v25, %v140_v8  ;;  %v155_v29 = vshrl.u32 %v672_v28, %v140_v8  ;;  %vm159_vm4 = vcmp.lt.s32.totalorder %v138_v6, 3  ;;  %vm160_vm5 = vcmp.lt.s32.totalorder %v138_v6, 4 }
  0x4a   :  { %v144_v30 = vor.u32 %v143_v20, %v142_v10  ;;  %v147_v31 = vor.u32 %v146_v21, %v145_v12  ;;  %v150_v32 = vor.u32 %v149_v23, %v148_v14  ;;  %v243_v51 = vsub.s32 32, %v242_v18 }
  0x4b   :  { %v153_v33 = vor.u32 %v152_v26, %v151_v24  ;;  %v156_v34 = vor.u32 %v155_v29, %v154_v27  ;;  %v245_v59 = vshll.u32 %v667_v9, %v242_v18  ;;  %v248_v63 = vshll.u32 %v668_v11, %v242_v18 }
  0x4c   :  { %v161_v35 = vsel %vm157_vm2, %v141_v19, %v144_v30  ;;  %v165_v36 = vsel %vm157_vm2, %v144_v30, %v147_v31  ;;  %v169_v37 = vsel %vm157_vm2, %v147_v31, %v150_v32  ;;  %v162_v39 = vsel %vm160_vm5, %v150_v32, 2102212464 }
  0x4d   :  { %v166_v40 = vsel %vm160_vm5, %v153_v33, 920167782  ;;  %v170_v41 = vsel %vm160_vm5, %v156_v34, 1326507024  ;;  %v163_v42 = vsel %vm159_vm4, %v147_v31, %v162_v39  ;;  %v246_v62 = vshrl.u32 %v668_v11, %v243_v51 }
  0x4e   :  { %v167_v43 = vsel %vm159_vm4, %v150_v32, %v166_v40  ;;  %v171_v44 = vsel %vm159_vm4, %v153_v33, %v170_v41  ;;  %v164_v46 = vsel %vm158_vm3, %v161_v35, %v163_v42  ;;  %v249_v0 = vshrl.u32 %v669_v13, %v243_v51 }
  0x4f   :  { %v168_v47 = vsel %vm158_vm3, %v165_v36, %v167_v43  ;;  %v172_v49 = vsel %vm158_vm3, %v169_v37, %v171_v44  ;;  %v180_v60 = vmul.u32 %v714_v16, %v164_v46  ;;  %v251_v1 = vshll.u32 %v669_v13, %v242_v18 }
  0x50   :  { %v722_v52 = vmul.u32.u64.low %v714_v16, %v172_v49  ;;  %v723_v54 = vmul.u32.u64.high %v714_v16, %v172_v49, %v722_v52  ;;  %v726_v55 = vmul.u32.u64.low %v714_v16, %v168_v47  ;;  %v727_v56 = vmul.u32.u64.high %v714_v16, %v168_v47, %v726_v55 }
  0x51   :  { %v252_v2 = vshrl.u32 %v670_v22, %v243_v51  ;;  %v66_v4 = vshrl.u32 %v64_v45, 8  ;;  %v71_v6 = vmul.f32 5.9604645e-08, %v69_v57  ;;  %v247_v8 = vor.u32 %v246_v62, %v245_v59 }
  0x52   :  { %vm182_vm6 = vc.u32 %v723_v54, %v726_v55  ;;  %v183_v3 = vadd.s32 1, %v727_v56  ;;  %v250_v10 = vor.u32 %v249_v0, %v248_v63  ;;  %v254_v15 = vshll.u32 %v670_v22, %v242_v18 }
  0x53   :  { %v253_v14 = vor.u32 %v252_v2, %v251_v1  ;;  %v255_v5 = vshrl.u32 %v671_v25, %v243_v51  ;;  %v257_v11 = vshll.u32 %v671_v25, %v242_v18  ;;  %v258_v19 = vshrl.u32 %v672_v28, %v243_v51 }
  0x54   :  { %v184_v12 = vsel %vm182_vm6, %v183_v3, %v727_v56  ;;  %vm260_vm7 = vcmp.lt.s32.totalorder %v241_v61, 1  ;;  %v244_v13 = vshrl.u32 %v667_v9, %v243_v51  ;;  %vm262_vm8 = vcmp.lt.s32.totalorder %v241_v61, 3 }
  0x55   :  { %v185_v16 = vadd.s32 %v184_v12, %v180_v60  ;;  %v256_v20 = vor.u32 %v255_v5, %v254_v15  ;;  %vm263_vm9 = vcmp.lt.s32.totalorder %v241_v61, 4  ;;  %v259_v23 = vor.u32 %v258_v19, %v257_v11 }
  0x56   :  { %vm261_vm10 = vcmp.lt.s32.totalorder %v241_v61, 2  ;;  %v276_v24 = vshll.u32 %v236_v7, 8  ;;  %v265_v26 = vsel %vm263_vm9, %v253_v14, 2102212464  ;;  %v268_v27 = vsel %vm260_vm7, %v247_v8, %v250_v10 }
  0x57   :  { %v186_v21 = vadd.s32 536870912, %v185_v16  ;;  %v269_v29 = vsel %vm263_vm9, %v256_v20, 920167782  ;;  %v272_v22 = vsel %vm260_vm7, %v250_v10, %v253_v14  ;;  %v273_v25 = vsel %vm263_vm9, %v259_v23, 1326507024 }
  0x58   :  { %v270_v18 = vsel %vm262_vm8, %v253_v14, %v269_v29  ;;  %602 = vlog2.f32 %v71_v6  ;;  %v264_v9 = vsel %vm260_vm7, %v244_v13, %v247_v8  ;;  %v274_v28 = vsel %vm262_vm8, %v256_v20, %v273_v25 }
  0x59   :  { %v187_v30 = vshrl.u32 %v186_v21, 30  ;;  %v266_v32 = vsel %vm262_vm8, %v250_v10, %v265_v26  ;;  %v271_v33 = vsel %vm261_vm10, %v268_v27, %v270_v18  ;;  %v275_v34 = vsel %vm261_vm10, %v272_v22, %v274_v28 }
  0x5a   :  { %v68_v35 = vcvt.s32.f32 %v66_v4  ;;  %v747_v36 = vmul.u32.u64.low %v276_v24, %v275_v34  ;;  %v748_v37 = vmul.u32.u64.high %v276_v24, %v275_v34, %v747_v36  ;;  %v267_v39 = vsel %vm261_vm10, %v264_v9, %v266_v32 }
  0x5b   :  { %v188_v31 = vshll.u32 %v187_v30, 30  ;;  %v751_v40 = vmul.u32.u64.low %v276_v24, %v271_v33  ;;  %v752_v41 = vmul.u32.u64.high %v276_v24, %v271_v33, %v751_v40  ;;  %v283_v45 = vmul.u32 %v276_v24, %v267_v39 }
  0x5c   :  { %v70_v43 = vadd.f32 0.5, %v68_v35  ;;  %v181_v59 = vadd.s32 %v726_v55, %v723_v54  ;;  %v211_v15 = vsub.s32 4, %v187_v30  ;;  %vm773_vm2 = vcmp.le.f32.partialorder %v228_v17, 0.7853982 }
  0x5d   :  { %v189_v38 = vsub.s32 %v185_v16, %v188_v31  ;;  %vm285_vm11 = vc.u32 %v748_v37, %v751_v40  ;;  %v286_v46 = vadd.s32 1, %v752_v41  ;;  %v284_v26 = vadd.s32 %v751_v40, %v748_v37 }
  0x5e   :  { %v72_v51 = vmul.f32 5.9604645e-08, %v70_v43  ;;  %v212_v20 = vsel %vm127_vm13, %v211_v15, %v187_v30  ;;  %vm230_vm3 = vcmp.lt.s32.totalorder %v706_v50, 0  ;;  %vm217_vm10 = vweird.f32 %v704_v48 }
  0x5f   :  { %v191_v42 = vsub.s32 0, %v189_v38  ;;  %v287_v52 = vsel %vm285_vm11, %v286_v46, %v752_v41  ;;  %v214_v29 = vsel %vm126_vm14, 0, %v212_v20 }
  0x60   :  { %v288_v57 = vadd.s32 %v287_v52, %v283_v45  ;;  %604 = vlog2.f32 %v72_v51  ;;  %v426_v32 = vadd.s32 3, %v214_v29  ;;  %v218_v37 = vand.u32 3, %v214_v29 }
  0x61   :  { %v571_v44 = vmin.u32 %v191_v42, %v189_v38 }
  0x62   :  { %v603_v49 = vpop.eup %602  ;;  %v289_v60 = vadd.s32 536870912, %v288_v57  ;;  %v427_v40 = vand.u32 3, %v426_v32  ;;  %vm223_vm4 = vcmp.eq.s32.totalorder %v218_v37, 2  ;;  %vm219_vm6 = vcmp.lt.s32.totalorder %v218_v37, 2 }
  0x63   :  { %v193_v47 = vclz %v571_v44  ;;  %v102_v58 = vmul.f32 0.6931472, %v603_v49  ;;  %vm220_vm7 = vcmp.eq.s32.totalorder %v218_v37, 0 }
  0x64   :  { %v759_v1 = vshrl.u32 %v289_v60, 30  ;;  %vm432_vm5 = vcmp.eq.s32.totalorder %v427_v40, 2  ;;  %vm429_vm8 = vcmp.eq.s32.totalorder %v427_v40, 0  ;;  %vm428_vm9 = vcmp.lt.s32.totalorder %v427_v40, 2 }
  0x65   :  { %v572_v56 = vadd.s32 4294967294, %v193_v47  ;;  %v105_v2 = vmul.f32 -2.0, %v102_v58 }
  0x66   :  { %v291_v6 = vshll.u32 %v759_v1, 30  ;;  %v314_v43 = vsub.s32 4, %v759_v1 }
  0x67   :  { %vm573_vm12 = vcmp.lt.s32.totalorder %v572_v56, 0  ;;  %606 = vrsqrt.f32 %v105_v2  ;;  %vm109_vm0 = vcmp.eq.f32.partialorder %v105_v2, inf  ;;  %v112_v36 = vand.u32 2147483648, %v105_v2 }
  0x68   :  { %v196_v61 = vsel %vm573_vm12, 0, %v572_v56  ;;  %v292_v10 = vsub.s32 %v288_v57, %v291_v6  ;;  %vm111_vm1 = vcmp.eq.f32.partialorder %v105_v2, 0.0  ;;  %v315_v17 = vsel %vm230_vm3, %v314_v43, %v759_v1 }
  0x69   :  { %v197_v62 = vsub.s32 32, %v196_v61  ;;  %v198_v63 = vshll.u32 %v189_v38, %v196_v61  ;;  %v201_v0 = vsub.s32 4294967266, %v196_v61  ;;  %v317_v1 = vsel %vm773_vm2, 0, %v315_v17 }
  0x6a   :  { %v294_v55 = vsub.s32 0, %v292_v10  ;;  %v605_v16 = vpop.eup %604 }
  0x6b   :  { %v199_v3 = vshrl.u32 %v181_v59, %v197_v62  ;;  %v202_v4 = vadd.s32 127, %v201_v0  ;;  %v104_v23 = vmul.f32 0.6931472, %v605_v16 }
  0x6c   :  { %v575_v5 = vmin.u32 %v294_v55, %v292_v10 }
  0x6d   :  { %v200_v7 = vor.u32 %v199_v3, %v198_v63  ;;  %v203_v8 = vshll.u32 %v202_v4, 23  ;;  %v767_v31 = vmul.f32 -2.0, %v104_v23 }
  0x6e   :  { %v296_v19 = vclz %v575_v5  ;;  %v321_v5 = vand.u32 3, %v317_v1 }
  0x6f   :  { %v204_v12 = vor.u32 4788187, %v203_v8  ;;  %v207_v54 = vcvt.s32.f32 %v200_v7  ;;  %v545_v7 = vld [vmem:[#allocation4 + $0x10] sm:$0xff]  ;;  %vm116_vm11 = vcmp.eq.f32.partialorder %v767_v31, inf  ;;  %v119_v15 = vand.u32 2147483648, %v767_v31 }
  0x70   :  { %v576_v21 = vadd.s32 4294967294, %v296_v19  ;;  %vm118_vm12 = vcmp.eq.f32.partialorder %v767_v31, 0.0 }
  0x71   :  { %v205_v14 = vand.u32 2147483647, %v204_v12  ;;  %v607_v18 = vpop.eup %606  ;;  %v530_v12 = vadd.s32 3, %v317_v1 }
  0x72   :  { %vm577_vm15 = vcmp.lt.s32.totalorder %v576_v21, 0  ;;  %v108_v33 = vmul.f32 %v607_v18, %v105_v2 }
  0x73   :  { %v208_v11 = vmul.f32 %v207_v54, %v205_v14  ;;  %v299_v22 = vsel %vm577_vm15, 0, %v576_v21  ;;  %v531_v16 = vand.u32 3, %v530_v12  ;;  %vm323_vm15 = vcmp.eq.s32.totalorder %v321_v5, 0 }
  0x74   :  { %v300_v25 = vsub.s32 32, %v299_v22  ;;  %v301_v9 = vshll.u32 %v292_v10, %v299_v22  ;;  %v304_v28 = vsub.s32 4294967266, %v299_v22  ;;  %v110_v41 = vsel %vm109_vm0, %v105_v2, %v108_v33 }
  0x75   :  { %v209_v13 = vxor.u32 2147483648, %v208_v11  ;;  %v113_v46 = vsel %vm111_vm1, %v112_v36, %v110_v41  ;;  %vm533_vm0 = vcmp.eq.s32.totalorder %v531_v16, 0  ;;  %vm322_vm1 = vcmp.lt.s32.totalorder %v321_v5, 2 }
  0x76   :  { %v302_v53 = vshrl.u32 %v284_v26, %v300_v25  ;;  %v305_v30 = vadd.s32 127, %v304_v28  ;;  %v121_v57 = vmul.f32 0.1, %v113_v46  ;;  %v544_v28 = vld [vmem:[#allocation4 + $0x8] sm:$0xff] }
  0x77   :  { %v210_v24 = vsel %vm127_vm13, %v209_v13, %v208_v11  ;;  %vm326_vm13 = vcmp.eq.s32.totalorder %v321_v5, 2 }
  0x78   :  { %v213_v27 = vsel %vm126_vm14, %v704_v48, %v210_v24  ;;  %v303_v34 = vor.u32 %v302_v53, %v301_v9  ;;  %v306_v35 = vshll.u32 %v305_v30, 23  ;;  %v543_v48 = vld [vmem:[#allocation4] sm:$0xff]  ;;  %vm536_vm14 = vcmp.eq.s32.totalorder %v531_v16, 2  ;;  %v546_v53 = vld [vmem:[#allocation4 + $0x18] sm:$0xff] }
  0x79   :  { %608 = vcosq.f32 %v213_v27 }
  0x7a   :  { %610 = vsinq.f32 %v213_v27  ;;  %v307_v38 = vor.u32 4788187, %v306_v35  ;;  %v310_v39 = vcvt.s32.f32 %v303_v34 }
  0x7b   :  { %612 = vrsqrt.f32 %v767_v31 }
  0x7c   :  { %v308_v42 = vand.u32 2147483647, %v307_v38 }
  0x7e   :  { %v311_v47 = vmul.f32 %v310_v39, %v308_v42 }
  0x80   :  { %v312_v56 = vxor.u32 2147483648, %v311_v47 }
  0x82   :  { %v313_v61 = vsel %vm230_vm3, %v312_v56, %v311_v47  ;;  %vm320_vm3 = vweird.f32 %v706_v50 }
  0x83   :  { %v609_v45 = vpop.eup %608  ;;  %v316_v2 = vsel %vm773_vm2, %v706_v50, %v313_v61  ;;  %vm532_vm2 = vcmp.lt.s32.totalorder %v531_v16, 2 }
  0x84   :  { %v611_v49 = vpop.eup %610  ;;  %v224_v51 = vxor.u32 2147483648, %v609_v45  ;;  %614 = vcosq.f32 %v316_v2 }
  0x85   :  { %v221_v52 = vxor.u32 2147483648, %v611_v49  ;;  %v613_v63 = vpop.eup %612  ;;  %616 = vsinq.f32 %v316_v2 }
  0x86   :  { %v225_v58 = vsel %vm223_vm4, %v224_v51, %v611_v49  ;;  %v434_v59 = vsel %vm432_vm5, %v224_v51, %v611_v49  ;;  %v115_v55 = vmul.f32 %v613_v63, %v767_v31 }
  0x87   :  { %v222_v60 = vsel %vm220_vm7, %v609_v45, %v221_v52  ;;  %v431_v62 = vsel %vm429_vm8, %v609_v45, %v221_v52 }
  0x88   :  { %v226_v0 = vsel %vm219_vm6, %v222_v60, %v225_v58  ;;  %v435_v3 = vsel %vm428_vm9, %v431_v62, %v434_v59  ;;  %v117_v11 = vsel %vm116_vm11, %v767_v31, %v115_v55 }
  0x89   :  { %v227_v4 = vsel %vm217_vm10, nan, %v226_v0  ;;  %v436_v6 = vsel %vm217_vm10, nan, %v435_v3  ;;  %v120_v13 = vsel %vm118_vm12, %v119_v15, %v117_v11 }
  0x8a   :  { %v331_v8 = vmul.f32 %v227_v4, %v121_v57  ;;  %v541_v10 = vmul.f32 %v436_v6, %v121_v57  ;;  %v122_v24 = vmul.f32 0.1, %v120_v13 }
  0x8c   :  { %v547_v54 = vadd.f32 %v543_v48, %v331_v8  ;;  %v551_v14 = vadd.f32 %v545_v7, %v541_v10 }
  0x8e   :  { %549 = vst [vmem:[#allocation7] sm:$0xff] %v547_v54  ;;  %553 = vst [vmem:[#allocation7 + $0x10] sm:$0xff] %v551_v14  ;;  %v615_v19 = vpop.eup %614 }
  0x8f   :  { %v617_v20 = vpop.eup %616  ;;  %v327_v21 = vxor.u32 2147483648, %v615_v19 }
  0x90   :  { %v324_v23 = vxor.u32 2147483648, %v617_v20 }
  0x91   :  { %v328_v26 = vsel %vm326_vm13, %v327_v21, %v617_v20  ;;  %v538_v27 = vsel %vm536_vm14, %v327_v21, %v617_v20 }
  0x92   :  { %v325_v29 = vsel %vm323_vm15, %v615_v19, %v324_v23  ;;  %v535_v22 = vsel %vm533_vm0, %v615_v19, %v324_v23 }
  0x93   :  { %v329_v18 = vsel %vm322_vm1, %v325_v29, %v328_v26  ;;  %v539_v25 = vsel %vm532_vm2, %v535_v22, %v538_v27 }
  0x94   :  { %v330_v9 = vsel %vm320_vm3, nan, %v329_v18  ;;  %v540_v31 = vsel %vm320_vm3, nan, %v539_v25 }
  0x95   :  { %v332_v30 = vmul.f32 %v330_v9, %v122_v24  ;;  %v542_v32 = vmul.f32 %v540_v31, %v122_v24 }
  0x97   :  { %v548_v33 = vadd.f32 %v544_v28, %v332_v30  ;;  %v552_v34 = vadd.f32 %v546_v53, %v542_v32 }
  0x99   :  { %550 = vst [vmem:[#allocation7 + $0x8] sm:$0xff] %v548_v33  ;;  %554 = vst [vmem:[#allocation7 + $0x18] sm:$0xff] %v552_v34 }
  0x9a   :  { %651 = shalt.err (!%p648_p12)
}
  0x9b   :  { %s652_s7 = scalar_lea.hbm %s810_s2, 512 }
  0x9c   :  { %p653_p13 = scmp.ne.s32.totalorder %s810_s2, %s652_s7  ;;  %p656_p0 = scmp.lt.u32.totalorder %s652_s7, %s810_s2 }
  0x9e   :  { %p658_p1 = pnand %p656_p0, %p653_p13 }
  0xa0   :  { %661 = shalt.err (!%p658_p1)
}
  0xa1   :  { %564 = dma.vmem_to_hbm [thread:$0]  %s562_s3, 512, %s810_s2, [#allocation6]  }
  0xa2   :  { %664 = dma.done.wait [#allocation6], 512  }
  0xa3   :  { %665 = vsyncadd [#allocation6], 4294966784 }
  0xa4   :  { %568 = vsyncpa [#allocation5], 1 }
  0xa5   :  { %569 = vsyncpa [#allocation6], 1 }

</bundles_post_ra>
